<compile_context>
chip_gen: v6e
topology: v6e:2x2x1
jax: 0.10.0
libtpu: 0.0.40
codegen_flags: <defaults>
</compile_context>

<pallas_src>
import math
import functools

import jax
import jax.numpy as jnp
from jax import lax
from jax.experimental import pallas as pl
from jax.experimental.pallas import tpu as pltpu

LANES = 128
ROW_ALIGN = 32        # rows padded to a multiple of 32 (covers f32/bf16/int8 tiling)
CHUNK_ROWS = 512      # in-block streaming chunk (bounds VMEM temporaries)


def _chip_tuning():
    """(block_rows, num_splits) per TPU generation; conservative fallback."""
    try:
        kind = jax.devices()[0].device_kind.lower()
    except Exception:
        kind = ""
    if "v7" in kind:
        return 8192, 2        # 4 MiB f32 blocks, use both TensorCores
    if "v6" in kind:
        return 8192, 1        # 4 MiB blocks, fits 32 MiB scoped-VMEM default
    if "v5" in kind:
        return 4096, 1        # 2 MiB blocks, fits 16 MiB scoped-VMEM default
    return 2048, 1            # unknown chip: stay well under 16 MiB


def _pick_chunk(block_rows):
    """Largest chunk <= CHUNK_ROWS that divides block_rows (block_rows % 32 == 0)."""
    if block_rows <= CHUNK_ROWS:
        return block_rows
    for c in range(CHUNK_ROWS, ROW_ALIGN - 1, -ROW_ALIGN):
        if block_rows % c == 0:
            return c
    return 8  # unreachable (block_rows is a multiple of 32)


def _dice_kernel(pred_ref, target_ref, inter_ref, total_ref, *,
                 thr_logit, valid_rows, block_rows, chunk_rows,
                 nblocks, blocks_per_split, may_clamp):
    s = pl.program_id(0)
    j = pl.program_id(1)

    @pl.when(j == 0)
    def _init():
        inter_ref[...] = jnp.zeros_like(inter_ref)
        total_ref[...] = jnp.zeros_like(total_ref)

    blk = s * blocks_per_split + j            # logical (un-clamped) block index
    n_chunks = block_rows // chunk_rows

    def chunk_partials(c, masked):
        r0 = pl.multiple_of(c * chunk_rows, chunk_rows)
        x = pred_ref[pl.ds(r0, chunk_rows), :].astype(jnp.float32)
        t = target_ref[pl.ds(r0, chunk_rows), :].astype(jnp.float32)
        if masked:
            # Row-level validity only (lane tail is neutralized by wrapper pad).
            row = (lax.broadcasted_iota(jnp.int32, (chunk_rows, LANES), 0)
                   + blk * block_rows + r0)
            ok = row < valid_rows
            t = jnp.where(ok, t, 0.0)
            hit = ok & (x > thr_logit)
        else:
            hit = x > thr_logit
        # Fused select chain:  pb*t == where(hit, t, 0);  pb + t == where(hit, t+1, t)
        inter_p = jnp.where(hit, t, 0.0)
        total_p = jnp.where(hit, t + 1.0, t)
        shape3 = (chunk_rows // 8, 8, LANES)  # tile-aligned; no relayout
        return (inter_p.reshape(shape3).sum(axis=0),
                total_p.reshape(shape3).sum(axis=0))

    def run_block(masked):
        def body(c, carry):
            ia, ta = carry
            ip, tp = chunk_partials(c, masked)
            return ia + ip, ta + tp
        zero = jnp.zeros((8, LANES), jnp.float32)
        ia, ta = lax.fori_loop(0, n_chunks, body, (zero, zero))
        inter_ref[...] += ia.reshape(1, 8, LANES)
        total_ref[...] += ta.reshape(1, 8, LANES)

    has_tail = (valid_rows % block_rows) != 0   # static (trace-time) flags
    if has_tail:
        @pl.when(blk < nblocks - 1)
        def _fast():
            run_block(masked=False)

        @pl.when(blk == nblocks - 1)
        def _tail():
            run_block(masked=True)
        # blk > nblocks-1 (clamped duplicate DMA): contributes nothing.
    elif may_clamp:
        @pl.when(blk < nblocks)
        def _fast():
            run_block(masked=False)
    else:
        run_block(masked=False)


def dice_score(pred: jax.Array, target: jax.Array,
               threshold: float = 0.5, smooth: float = 1e-6) -> jax.Array:
    """Pallas TPU implementation of DiceScore.forward (returns a scalar f32)."""
    n = pred.size
    assert target.size == n
    if n == 0:
        return jnp.float32(1.0)   # (2*0+s)/(0+s)

    # sigmoid(x) > thr  <=>  x > logit(thr): compare raw logits, no EUP work.
    if threshold <= 0.0:
        thr_logit = -float("inf")
    elif threshold >= 1.0:
        thr_logit = float("inf")
    else:
        thr_logit = math.log(threshold / (1.0 - threshold))

    if not jnp.issubdtype(pred.dtype, jnp.floating):
        pred = pred.astype(jnp.float32)

    # Keep native dtypes (bool/int8 targets stream at 1 B/elem); cast in-vreg.
    pred_flat = pred.reshape(-1)
    target_flat = target.reshape(-1)

    align = ROW_ALIGN * LANES
    if n % align != 0:
        pad = align - (n % align)
        # Padded logits are -inf (never exceed any threshold), padded targets 0,
        # so the lane/sublane tail needs no per-element mask in the kernel.
        pred_flat = jnp.pad(pred_flat, (0, pad), constant_values=-float("inf"))
        target_flat = jnp.pad(target_flat, (0, pad), constant_values=0)

    rows = pred_flat.size // LANES            # multiple of ROW_ALIGN
    pred2d = pred_flat.reshape(rows, LANES)
    target2d = target_flat.reshape(rows, LANES)

    pref_rows, pref_splits = _chip_tuning()
    block_rows = min(pref_rows, rows)
    nblocks = pl.cdiv(rows, block_rows)
    num_splits = min(pref_splits, nblocks)
    blocks_per_split = pl.cdiv(nblocks, num_splits)
    chunk_rows = _pick_chunk(block_rows)

    kernel = functools.partial(
        _dice_kernel,
        thr_logit=thr_logit, valid_rows=rows, block_rows=block_rows,
        chunk_rows=chunk_rows, nblocks=nblocks,
        blocks_per_split=blocks_per_split,
        may_clamp=(num_splits * blocks_per_split > nblocks))

    def in_map(s, j):
        # Clamp so the DMA never addresses past the array; clamped duplicate
        # iterations are skipped inside the kernel.
        return (jnp.minimum(s * blocks_per_split + j, nblocks - 1), 0)

    inter_out, total_out = pl.pallas_call(
        kernel,
        out_shape=(jax.ShapeDtypeStruct((num_splits, 8, LANES), jnp.float32),
                   jax.ShapeDtypeStruct((num_splits, 8, LANES), jnp.float32)),
        grid_spec=pltpu.PrefetchScalarGridSpec(
            num_scalar_prefetch=0,
            grid=(num_splits, blocks_per_split),
            in_specs=[
                pl.BlockSpec((block_rows, LANES), in_map),
                pl.BlockSpec((block_rows, LANES), in_map),
            ],
            out_specs=[
                pl.BlockSpec((1, 8, LANES), lambda s, j: (s, 0, 0)),
                pl.BlockSpec((1, 8, LANES), lambda s, j: (s, 0, 0)),
            ],
        ),
        compiler_params=pltpu.CompilerParams(
            dimension_semantics=("parallel", "arbitrary")),
    )(pred2d, target2d)

    inter = jnp.sum(inter_out)
    total = jnp.sum(total_out)
    return (2.0 * inter + smooth) / (total + smooth)


def dice_score_ref(pred, target, threshold=0.5, smooth=1e-6):
    p = jax.nn.sigmoid(pred.astype(jnp.float32))
    pb = (p > threshold).astype(jnp.float32).reshape(-1)
    t = target.astype(jnp.float32).reshape(-1)
    inter = jnp.sum(pb * t)
    total = jnp.sum(pb) + jnp.sum(t)
    return (2.0 * inter + smooth) / (total + smooth)


if __name__ == "__main__":
    key = jax.random.PRNGKey(0)
    k1, k2 = jax.random.split(key)
    # NCHW, as the PyTorch module would receive from a segmentation head
    pred = jax.random.normal(k1, (2, 4, 16, 16), dtype=jnp.float32)      # logits
    target = (jax.random.uniform(k2, (2, 4, 16, 16)) > 0.5).astype(jnp.float32)

    dice = dice_score(pred, target)
    jax.block_until_ready(dice)

    ref = dice_score_ref(pred, target)
    assert jnp.allclose(dice, ref, atol=1e-5, rtol=1e-5), (dice, ref)
    print("KERNEL_OK")
</pallas_src>

<mosaic_0001>
module attributes {stable_mosaic.version = 11 : i64} {
  func.func @_dice_kernel(%arg0: i32, %arg1: i32, %arg2: memref<32x128xf32, #tpu.memory_space<vmem>>, %arg3: memref<32x128xf32, #tpu.memory_space<vmem>>, %arg4: memref<1x8x128xf32, #tpu.memory_space<vmem>>, %arg5: memref<1x8x128xf32, #tpu.memory_space<vmem>>) attributes {dimension_semantics = [#tpu.dimension_semantics<parallel>, #tpu.dimension_semantics<arbitrary>], iteration_bounds = array<i64: 1, 1>, scalar_prefetch = 0 : i64, scratch_operands = 0 : i64, tpu.core_type = #tpu.core_type<tc>, window_params = [{transform_indices = @transform_0, window_bounds = array<i64: 32, 128>}, {transform_indices = @transform_1, window_bounds = array<i64: 32, 128>}, {transform_indices = @transform_2, window_bounds = array<i64: 1, 8, 128>}, {transform_indices = @transform_3, window_bounds = array<i64: 1, 8, 128>}]} {
    %c0_i32 = arith.constant 0 : i32
    %0 = arith.cmpi eq, %arg1, %c0_i32 : i32
    %1 = arith.extui %0 : i1 to i32
    %c0_i32_0 = arith.constant 0 : i32
    %2 = arith.cmpi ne, %1, %c0_i32_0 : i32
    scf.if %2 {
      %cst_20 = arith.constant 0.000000e+00 : f32
      %31 = vector.broadcast %cst_20 : f32 to vector<1x8x128xf32>
      %c0_21 = arith.constant 0 : index
      %c0_22 = arith.constant 0 : index
      %c0_23 = arith.constant 0 : index
      %32 = vector.load %arg4[%c0_21, %c0_22, %c0_23] : memref<1x8x128xf32, #tpu.memory_space<vmem>>, vector<1x8x128xf32>
      tpu.vector_store %arg4[%c0_21, %c0_22, %c0_23], %31 {strides = array<i32>} : memref<1x8x128xf32, #tpu.memory_space<vmem>>, vector<1x8x128xf32>,
      %cst_24 = arith.constant 0.000000e+00 : f32
      %33 = vector.broadcast %cst_24 : f32 to vector<1x8x128xf32>
      %c0_25 = arith.constant 0 : index
      %c0_26 = arith.constant 0 : index
      %c0_27 = arith.constant 0 : index
      %34 = vector.load %arg5[%c0_25, %c0_26, %c0_27] : memref<1x8x128xf32, #tpu.memory_space<vmem>>, vector<1x8x128xf32>
      tpu.vector_store %arg5[%c0_25, %c0_26, %c0_27], %33 {strides = array<i32>} : memref<1x8x128xf32, #tpu.memory_space<vmem>>, vector<1x8x128xf32>,
    } else {
    }
    %cst = arith.constant 0.000000e+00 : f32
    %3 = vector.broadcast %cst : f32 to vector<8x128xf32>
    %c0_i32_1 = arith.constant 0 : i32
    %c32_i32 = arith.constant 32 : i32
    %4 = arith.muli %c0_i32_1, %c32_i32 : i32
    %5 = tpu.assume_multiple %4, 32 : i32
    %6 = arith.index_cast %5 : i32 to index
    %c0 = arith.constant 0 : index
    %7 = vector.load %arg2[%6, %c0] : memref<32x128xf32, #tpu.memory_space<vmem>>, vector<32x128xf32>
    %8 = arith.index_cast %5 : i32 to index
    %c0_2 = arith.constant 0 : index
    %9 = vector.load %arg3[%8, %c0_2] : memref<32x128xf32, #tpu.memory_space<vmem>>, vector<32x128xf32>
    %cst_3 = arith.constant 0.000000e+00 : f32
    %10 = vector.broadcast %cst_3 : f32 to vector<32x128xf32>
    %11 = arith.cmpf ogt, %7, %10 : vector<32x128xf32>
    %cst_4 = arith.constant 0.000000e+00 : f32
    %12 = vector.broadcast %cst_4 : f32 to vector<32x128xf32>
    %13 = arith.select %11, %9, %12 : vector<32x128xi1>, vector<32x128xf32>
    %cst_5 = arith.constant 1.000000e+00 : f32
    %14 = vector.broadcast %cst_5 : f32 to vector<32x128xf32>
    %15 = arith.addf %9, %14 : vector<32x128xf32>
    %16 = arith.select %11, %15, %9 : vector<32x128xi1>, vector<32x128xf32>
    %17 = vector.shape_cast %13 : vector<32x128xf32> to vector<4x8x128xf32>
    %cst_6 = arith.constant dense<0.000000e+00> : vector<8x128xf32>
    %18 = vector.multi_reduction <add>, %17, %cst_6 [0] : vector<4x8x128xf32> to vector<8x128xf32>
    %19 = vector.shape_cast %16 : vector<32x128xf32> to vector<4x8x128xf32>
    %cst_7 = arith.constant dense<0.000000e+00> : vector<8x128xf32>
    %20 = vector.multi_reduction <add>, %19, %cst_7 [0] : vector<4x8x128xf32> to vector<8x128xf32>
    %21 = arith.addf %3, %18 : vector<8x128xf32>
    %22 = arith.addf %3, %20 : vector<8x128xf32>
    %c1_i32 = arith.constant 1 : i32
    %c0_8 = arith.constant 0 : index
    %c0_9 = arith.constant 0 : index
    %c0_10 = arith.constant 0 : index
    %23 = vector.load %arg4[%c0_8, %c0_9, %c0_10] : memref<1x8x128xf32, #tpu.memory_space<vmem>>, vector<1x8x128xf32>
    %24 = vector.shape_cast %21 : vector<8x128xf32> to vector<1x8x128xf32>
    %25 = arith.addf %23, %24 : vector<1x8x128xf32>
    %c0_11 = arith.constant 0 : index
    %c0_12 = arith.constant 0 : index
    %c0_13 = arith.constant 0 : index
    %26 = vector.load %arg4[%c0_11, %c0_12, %c0_13] : memref<1x8x128xf32, #tpu.memory_space<vmem>>, vector<1x8x128xf32>
    tpu.vector_store %arg4[%c0_11, %c0_12, %c0_13], %25 {strides = array<i32>} : memref<1x8x128xf32, #tpu.memory_space<vmem>>, vector<1x8x128xf32>,
    %c0_14 = arith.constant 0 : index
    %c0_15 = arith.constant 0 : index
    %c0_16 = arith.constant 0 : index
    %27 = vector.load %arg5[%c0_14, %c0_15, %c0_16] : memref<1x8x128xf32, #tpu.memory_space<vmem>>, vector<1x8x128xf32>
    %28 = vector.shape_cast %22 : vector<8x128xf32> to vector<1x8x128xf32>
    %29 = arith.addf %27, %28 : vector<1x8x128xf32>
    %c0_17 = arith.constant 0 : index
    %c0_18 = arith.constant 0 : index
    %c0_19 = arith.constant 0 : index
    %30 = vector.load %arg5[%c0_17, %c0_18, %c0_19] : memref<1x8x128xf32, #tpu.memory_space<vmem>>, vector<1x8x128xf32>
    tpu.vector_store %arg5[%c0_17, %c0_18, %c0_19], %29 {strides = array<i32>} : memref<1x8x128xf32, #tpu.memory_space<vmem>>, vector<1x8x128xf32>,
    return
  }
  func.func @transform_0(%arg0: i32, %arg1: i32) -> (i32, i32) {
    %c1_i32 = arith.constant 1 : i32
    %0 = arith.muli %arg0, %c1_i32 : i32
    %1 = arith.addi %0, %arg1 : i32
    %c0_i32 = arith.constant 0 : i32
    %2 = arith.minsi %1, %c0_i32 : i32
    %c0_i32_0 = arith.constant 0 : i32
    %c0_i32_1 = arith.constant 0 : i32
    return %2, %c0_i32_0 : i32, i32
  }
  func.func @transform_1(%arg0: i32, %arg1: i32) -> (i32, i32) {
    %c1_i32 = arith.constant 1 : i32
    %0 = arith.muli %arg0, %c1_i32 : i32
    %1 = arith.addi %0, %arg1 : i32
    %c0_i32 = arith.constant 0 : i32
    %2 = arith.minsi %1, %c0_i32 : i32
    %c0_i32_0 = arith.constant 0 : i32
    %c0_i32_1 = arith.constant 0 : i32
    return %2, %c0_i32_0 : i32, i32
  }
  func.func @transform_2(%arg0: i32, %arg1: i32) -> (i32, i32, i32) {
    %c0_i32 = arith.constant 0 : i32
    %c0_i32_0 = arith.constant 0 : i32
    %c0_i32_1 = arith.constant 0 : i32
    return %arg0, %c0_i32, %c0_i32_0 : i32, i32, i32
  }
  func.func @transform_3(%arg0: i32, %arg1: i32) -> (i32, i32, i32) {
    %c0_i32 = arith.constant 0 : i32
    %c0_i32_0 = arith.constant 0 : i32
    %c0_i32_1 = arith.constant 0 : i32
    return %arg0, %c0_i32, %c0_i32_0 : i32, i32, i32
  }
}

</mosaic_0001>

<bundles_post_ra>
// kernel: tpu_custom_call.1
= control target key start
LH: loop header
LB: loop body
LE: loop exit
PB: predicated region body
PF: predicated region fallthrough
CT: control target
= control target key end

     0   :  { %9 = vsyncpa [#allocation3], 0  ;;  %s280_s0 = inlined_call_operand.hbm [shape: f32[32,128], index: 0, kind: input, shape index: {}]   ;;  %s281_s1 = inlined_call_operand.hbm [shape: f32[32,128], index: 1, kind: input, shape index: {}]   ;;  %s282_s2 = inlined_call_operand.hbm [shape: f32[1,8,128], index: 2, kind: output, shape index: {0}]   ;;  %s283_s3 = inlined_call_operand.hbm [shape: f32[1,8,128], index: 3, kind: output, shape index: {1}]  }
   0x1   :  { %10 = vsyncpa [#allocation6], 0 }
   0x2   :  { %11 = vsyncpa [#allocation4], 0 }
   0x3   :  { %12 = vsyncpa [#allocation9], 0  ;;  %s236_s12 = smov [#allocation2]  }
   0x4   :  { %s24_s13 = sshll.u32 %s236_s12, 4  ;;  %s25_s13 = int_to_ptr.vmem [resolvable:$true] %s24_s13 }
   0x5   :  { %s156_s14 = scalar_lea.vmem %s25_s13, 512  ;;  %p161_p1 = scmp.lt.s32.totalorder %s25_s13, %s25_s13 }
   0x6   :  { %p157_p0 = scmp.ne.s32.totalorder %s25_s13, %s156_s14  ;;  %p162_p2 = scmp.lt.s32.totalorder %s156_s14, %s156_s14 }
   0x8   :  { %p163_p3 = por %p162_p2, %p161_p1 }
   0xa   :  { %p164_p4 = pnand %p163_p3, %p157_p0 }
   0xc   :  { %167 = shalt.err (!%p164_p4)
}
   0xd   :  { %s237_s15 = smov 128   ;;  %s238_s16 = smov 8  }
   0xe   :  { %30 = dma.hbm_to_vmem [thread:$0]  %s280_s0, 512, %s25_s13, [#allocation3], %s237_s15, %s237_s15, %s238_s16  }
   0xf   :  { %s239_s19 = smov [#allocation5]  }
  0x10   :  { %s42_s20 = sshll.u32 %s239_s19, 4  ;;  %s43_s20 = int_to_ptr.vmem [resolvable:$true] %s42_s20 }
  0x11   :  { %s176_s21 = scalar_lea.vmem %s43_s20, 512  ;;  %p181_p6 = scmp.lt.s32.totalorder %s43_s20, %s43_s20 }
  0x12   :  { %p177_p5 = scmp.ne.s32.totalorder %s43_s20, %s176_s21  ;;  %p182_p7 = scmp.lt.s32.totalorder %s176_s21, %s176_s21 }
  0x14   :  { %p183_p8 = por %p182_p7, %p181_p6 }
  0x16   :  { %p184_p9 = pnand %p183_p8, %p177_p5 }
  0x18   :  { %187 = shalt.err (!%p184_p9)
}
  0x19   :  { %48 = dma.hbm_to_vmem [thread:$0]  %s281_s1, 512, %s43_s20, [#allocation6], %s237_s15, %s237_s15, %s238_s16  }
  0x1a   :  { %228 = dma.done.wait [#allocation3], 512  }
  0x1b   :  { %229 = vsyncadd [#allocation3], 4294966784 }
  0x1c   :  { %230 = dma.done.wait [#allocation6], 512  }
  0x1d   :  { %231 = vsyncadd [#allocation6], 4294966784  ;;  %v69_v0 = vld [vmem:[#allocation2] sm:$0xff]  ;;  %v70_v1 = vld [vmem:[#allocation2 + $0x8] sm:$0xff]  ;;  %s240_s0 = smov [#allocation7]   ;;  %s241_s24 = smov [#allocation8]  }
  0x1e   :  { %v71_v2 = vld [vmem:[#allocation2 + $0x10] sm:$0xff]  ;;  %v72_v3 = vld [vmem:[#allocation2 + $0x18] sm:$0xff]  ;;  %v73_v4 = vld [vmem:[#allocation5] sm:$0xff]  ;;  %vm77_vm0 = vcmp.gt.f32.partialorder %v69_v0, 0.0  ;;  %vm78_vm1 = vcmp.gt.f32.partialorder %v70_v1, 0.0  ;;  %s113_s1 = sshll.u32 %s240_s0, 4  ;;  %s114_s1 = int_to_ptr.vmem [resolvable:$true] %s113_s1 }
  0x1f   :  { %v74_v5 = vld [vmem:[#allocation5 + $0x8] sm:$0xff]  ;;  %vm79_vm2 = vcmp.gt.f32.partialorder %v71_v2, 0.0  ;;  %v75_v6 = vld [vmem:[#allocation5 + $0x10] sm:$0xff]  ;;  %v76_v7 = vld [vmem:[#allocation5 + $0x18] sm:$0xff]  ;;  %vm80_vm3 = vcmp.gt.f32.partialorder %v72_v3, 0.0  ;;  %v81_v8 = vsel %vm77_vm0, %v73_v4, 0.0  ;;  %p193_p11 = scmp.lt.s32.totalorder %s114_s1, %s114_s1 }
  0x20   :  { %v82_v9 = vsel %vm78_vm1, %v74_v5, 0.0  ;;  %v85_v10 = vadd.f32 1.0, %v73_v4  ;;  %v83_v11 = vsel %vm79_vm2, %v75_v6, 0.0  ;;  %v86_v13 = vadd.f32 1.0, %v74_v5  ;;  %s123_s25 = sshll.u32 %s241_s24, 4  ;;  %s188_s26 = scalar_lea.vmem %s114_s1, 128  ;;  %s124_s25 = int_to_ptr.vmem [resolvable:$true] %s123_s25 }
  0x21   :  { %v93_v12 = vadd.f32 %v82_v9, %v81_v8  ;;  %v84_v14 = vsel %vm80_vm3, %v76_v7, 0.0  ;;  %v87_v15 = vadd.f32 1.0, %v75_v6  ;;  %v88_v16 = vadd.f32 1.0, %v76_v7  ;;  %p189_p10 = scmp.ne.s32.totalorder %s114_s1, %s188_s26  ;;  %p194_p12 = scmp.lt.s32.totalorder %s188_s26, %s188_s26 }
  0x22   :  { %v89_v17 = vsel %vm77_vm0, %v85_v10, %v73_v4  ;;  %v90_v19 = vsel %vm78_vm1, %v86_v13, %v74_v5 }
  0x23   :  { %v94_v18 = vadd.f32 %v93_v12, %v83_v11  ;;  %v91_v20 = vsel %vm79_vm2, %v87_v15, %v75_v6  ;;  %v96_v21 = vadd.f32 %v90_v19, %v89_v17  ;;  %v92_v23 = vsel %vm80_vm3, %v88_v16, %v76_v7  ;;  %p195_p13 = por %p194_p12, %p193_p11 }
  0x25   :  { %v95_v22 = vadd.f32 %v94_v18, %v84_v14  ;;  %v97_v24 = vadd.f32 %v96_v21, %v91_v20  ;;  %p196_p0 = pnand %p195_p13, %p189_p10 }
  0x27   :  { %v98_v25 = vadd.f32 %v97_v24, %v92_v23  ;;  %103 = vst [vmem:[#allocation7] sm:$0xff] %v95_v22 }
  0x28   :  { %199 = shalt.err (!%p196_p0)
}
  0x29   :  { %116 = dma.vmem_to_hbm [thread:$0]  %s114_s1, 128, %s282_s2, [#allocation4]   ;;  %106 = vst [vmem:[#allocation8] sm:$0xff] %v98_v25 }
  0x2a   :  { %s208_s29 = scalar_lea.vmem %s124_s25, 128  ;;  %p213_p2 = scmp.lt.s32.totalorder %s124_s25, %s124_s25 }
  0x2b   :  { %p209_p1 = scmp.ne.s32.totalorder %s124_s25, %s208_s29  ;;  %p214_p3 = scmp.lt.s32.totalorder %s208_s29, %s208_s29 }
  0x2d   :  { %p215_p4 = por %p214_p3, %p213_p2 }
  0x2f   :  { %p216_p5 = pnand %p215_p4, %p209_p1 }
  0x31   :  { %219 = shalt.err (!%p216_p5)
}
  0x32   :  { %126 = dma.vmem_to_hbm [thread:$0]  %s124_s25, 128, %s283_s3, [#allocation9]  }
  0x33   :  { %232 = dma.done.wait [#allocation4], 128  }
  0x34   :  { %233 = vsyncadd [#allocation4], 4294967168 }
  0x35   :  { %234 = dma.done.wait [#allocation9], 128  }
  0x36   :  { %235 = vsyncadd [#allocation9], 4294967168 }
  0x37   :  { %133 = vsyncpa [#allocation3], 1 }
  0x38   :  { %134 = vsyncpa [#allocation6], 1 }
  0x39   :  { %135 = vsyncpa [#allocation4], 1 }
  0x3a   :  { %136 = vsyncpa [#allocation9], 1 }

</bundles_post_ra>
